<compile_context>
chip_gen: v5e
topology: v5e:2x2
jax: 0.10.0
libtpu: 0.0.40
codegen_flags: <defaults>
</compile_context>

<pallas_src>
import functools

import jax
import jax.numpy as jnp
from jax import lax
from jax.experimental import pallas as pl
from jax.experimental.pallas import tpu as pltpu


def _round_up(a: int, b: int) -> int:
    return ((a + b - 1) // b) * b


def _label_smooth_kernel(x_ref, t_ref, o_ref, *, smoothing: float, num_classes: int):
    # x_ref: (TILE_N, C) logits (any float dtype), t_ref: (TILE_N, 1) int32 targets,
    # o_ref: (TILE_N, 1) f32 per-row loss.
    x = x_ref[...].astype(jnp.float32)            # f32 math in-kernel (v5e has no bf16 VPU/EUP)
    t = t_ref[...]                                 # (TILE_N, 1)
    tn, c = x.shape

    # Numerically-stable log-partition per row: logZ = m + log(sum(exp(x - m)))
    m = jnp.max(x, axis=-1, keepdims=True)                               # (TILE_N, 1)
    lse = jnp.log(jnp.sum(jnp.exp(x - m), axis=-1, keepdims=True))       # (TILE_N, 1)
    log_z = m + lse                                                      # (TILE_N, 1)

    # Row sum of logits and the logit at the target class (select + lane reduce,
    # no materialized one-hot weight matrix or log_prob matrix).
    row_sum = jnp.sum(x, axis=-1, keepdims=True)                         # (TILE_N, 1)
    col = lax.broadcasted_iota(jnp.int32, (tn, c), 1)
    x_t = jnp.sum(jnp.where(col == t, x, 0.0), axis=-1, keepdims=True)   # (TILE_N, 1)

    # Global class count (not block-local) so this stays correct if C is ever tiled.
    c_f = jnp.float32(num_classes)
    off = jnp.float32(smoothing / max(num_classes - 1, 1))   # C==1 is degenerate; guard div-by-zero
    on_minus_off = jnp.float32(1.0 - smoothing) - off

    sum_logp = row_sum - c_f * log_z          # sum_j log_prob_j
    logp_t = x_t - log_z                      # log_prob at target class
    o_ref[...] = -(off * sum_logp + on_minus_off * logp_t)


def label_smooth_loss(x: jax.Array, target: jax.Array,
                      smoothing: float = 0.0, tile_n: int = 512) -> jax.Array:
    """x: (N, C) float (f32 or bf16); target: (N,) int class indices. Scalar f32 loss."""
    n, c = x.shape

    # Tile size: multiple of 8 sublanes, no larger than (padded) N.
    tile_n = min(int(tile_n), _round_up(n, 8))
    tile_n = max(8, (tile_n // 8) * 8)
    n_pad = _round_up(n, tile_n)

    if n_pad != n:
        # Padded rows produce finite garbage-free losses (zeros in, log(C) out) and
        # are sliced away before the mean, which divides by the *global* N.
        x = jnp.pad(x, ((0, n_pad - n), (0, 0)))
        target = jnp.pad(target, ((0, n_pad - n),))

    t2d = target.astype(jnp.int32).reshape(n_pad, 1)
    grid = (n_pad // tile_n,)

    kernel = functools.partial(_label_smooth_kernel,
                               smoothing=float(smoothing), num_classes=c)

    per_row = pl.pallas_call(
        kernel,
        out_shape=jax.ShapeDtypeStruct((n_pad, 1), jnp.float32),
        grid_spec=pltpu.PrefetchScalarGridSpec(
            num_scalar_prefetch=0,
            grid=grid,
            in_specs=[
                pl.BlockSpec((tile_n, c), lambda i: (i, 0)),   # logits tile
                pl.BlockSpec((tile_n, 1), lambda i: (i, 0)),   # targets tile
            ],
            out_specs=pl.BlockSpec((tile_n, 1), lambda i: (i, 0)),
        ),
        compiler_params=pltpu.CompilerParams(
            # Independent tiles -> shard the row loop across TensorCores on v7x.
            dimension_semantics=("parallel",),
        ),
    )(x, t2d)

    return jnp.sum(per_row[:n, 0]) / jnp.float32(n)


def _reference(x, target, smoothing):
    xf = x.astype(jnp.float32)
    log_prob = jax.nn.log_softmax(xf, axis=-1)
    n, c = x.shape
    off = smoothing / (c - 1.0)
    onehot = jax.nn.one_hot(target, c, dtype=jnp.float32)
    weight = off * (1.0 - onehot) + (1.0 - smoothing) * onehot
    return jnp.mean(jnp.sum(-weight * log_prob, axis=-1))


if __name__ == "__main__":
    key = jax.random.PRNGKey(0)
    k1, k2 = jax.random.split(key)

    N, C = 200, 128          # N deliberately not a tile multiple -> exercises padding
    smoothing = 0.1

    x = jax.random.normal(k1, (N, C), dtype=jnp.float32)
    target = jax.random.randint(k2, (N,), 0, C, dtype=jnp.int32)

    # f32 logits, tile_n=64 -> 4-step pipelined grid at this small size.
    loss = jax.block_until_ready(label_smooth_loss(x, target, smoothing, tile_n=64))
    ref = jax.block_until_ready(_reference(x, target, smoothing))
    assert jnp.allclose(loss, ref, rtol=5e-4, atol=5e-4), (loss, ref)

    # bf16 logits in HBM (halves read bandwidth); in-kernel math stays f32.
    x_bf = x.astype(jnp.bfloat16)
    loss_bf = jax.block_until_ready(label_smooth_loss(x_bf, target, smoothing, tile_n=64))
    ref_bf = jax.block_until_ready(_reference(x_bf, target, smoothing))
    assert jnp.allclose(loss_bf, ref_bf, rtol=5e-4, atol=5e-4), (loss_bf, ref_bf)

    print("KERNEL_OK")
</pallas_src>

<mosaic_0001>
module attributes {stable_mosaic.version = 11 : i64} {
  func.func @_label_smooth_kernel(%arg0: i32, %arg1: memref<64x128xf32, #tpu.memory_space<vmem>>, %arg2: memref<64x1xi32, #tpu.memory_space<vmem>>, %arg3: memref<64x1xf32, #tpu.memory_space<vmem>>) attributes {dimension_semantics = [#tpu.dimension_semantics<parallel>], iteration_bounds = array<i64: 4>, scalar_prefetch = 0 : i64, scratch_operands = 0 : i64, tpu.core_type = #tpu.core_type<tc>, window_params = [{transform_indices = @transform_0, window_bounds = array<i64: 64, 128>}, {transform_indices = @transform_1, window_bounds = array<i64: 64, 1>}, {transform_indices = @transform_2, window_bounds = array<i64: 64, 1>}]} {
    %c0 = arith.constant 0 : index
    %c0_0 = arith.constant 0 : index
    %0 = vector.load %arg1[%c0, %c0_0] : memref<64x128xf32, #tpu.memory_space<vmem>>, vector<64x128xf32>
    %c0_1 = arith.constant 0 : index
    %c0_2 = arith.constant 0 : index
    %1 = vector.load %arg2[%c0_1, %c0_2] : memref<64x1xi32, #tpu.memory_space<vmem>>, vector<64x1xi32>
    %cst = arith.constant dense<0xFF800000> : vector<64xf32>
    %2 = vector.multi_reduction <maximumf>, %0, %cst [1] : vector<64x128xf32> to vector<64xf32>
    %3 = vector.shape_cast %2 : vector<64xf32> to vector<64x1xf32>
    %4 = vector.broadcast %3 : vector<64x1xf32> to vector<64x128xf32>
    %5 = arith.subf %0, %4 : vector<64x128xf32>
    %6 = math.exp %5 : vector<64x128xf32>
    %cst_3 = arith.constant dense<0.000000e+00> : vector<64xf32>
    %7 = vector.multi_reduction <add>, %6, %cst_3 [1] : vector<64x128xf32> to vector<64xf32>
    %8 = vector.shape_cast %7 : vector<64xf32> to vector<64x1xf32>
    %9 = math.log %8 : vector<64x1xf32>
    %10 = arith.addf %3, %9 : vector<64x1xf32>
    %cst_4 = arith.constant dense<0.000000e+00> : vector<64xf32>
    %11 = vector.multi_reduction <add>, %0, %cst_4 [1] : vector<64x128xf32> to vector<64xf32>
    %12 = vector.shape_cast %11 : vector<64xf32> to vector<64x1xf32>
    %13 = tpu.iota {dimensions = array<i32: 1>} : vector<64x128xi32>
    %14 = vector.broadcast %1 : vector<64x1xi32> to vector<64x128xi32>
    %15 = arith.cmpi eq, %13, %14 : vector<64x128xi32>
    %cst_5 = arith.constant 0.000000e+00 : f32
    %16 = vector.broadcast %cst_5 : f32 to vector<64x128xf32>
    %17 = arith.select %15, %0, %16 : vector<64x128xi1>, vector<64x128xf32>
    %cst_6 = arith.constant dense<0.000000e+00> : vector<64xf32>
    %18 = vector.multi_reduction <add>, %17, %cst_6 [1] : vector<64x128xf32> to vector<64xf32>
    %19 = vector.shape_cast %18 : vector<64xf32> to vector<64x1xf32>
    %cst_7 = arith.constant 0.899999976 : f32
    %cst_8 = arith.constant 7.87401571E-4 : f32
    %20 = arith.subf %cst_7, %cst_8 : f32
    %cst_9 = arith.constant 1.280000e+02 : f32
    %21 = vector.broadcast %cst_9 : f32 to vector<64x1xf32>
    %22 = arith.mulf %21, %10 : vector<64x1xf32>
    %23 = arith.subf %12, %22 : vector<64x1xf32>
    %24 = arith.subf %19, %10 : vector<64x1xf32>
    %cst_10 = arith.constant 7.87401571E-4 : f32
    %25 = vector.broadcast %cst_10 : f32 to vector<64x1xf32>
    %26 = arith.mulf %25, %23 : vector<64x1xf32>
    %27 = vector.broadcast %20 : f32 to vector<64x1xf32>
    %28 = arith.mulf %27, %24 : vector<64x1xf32>
    %29 = arith.addf %26, %28 : vector<64x1xf32>
    %cst_11 = arith.constant 0.000000e+00 : f32
    %30 = vector.broadcast %cst_11 : f32 to vector<64x1xf32>
    %31 = arith.subf %30, %29 : vector<64x1xf32>
    %c0_12 = arith.constant 0 : index
    %c0_13 = arith.constant 0 : index
    %32 = vector.load %arg3[%c0_12, %c0_13] : memref<64x1xf32, #tpu.memory_space<vmem>>, vector<64x1xf32>
    tpu.vector_store %arg3[%c0_12, %c0_13], %31 {strides = array<i32>} : memref<64x1xf32, #tpu.memory_space<vmem>>, vector<64x1xf32>,
    return
  }
  func.func @transform_0(%arg0: i32) -> (i32, i32) {
    %c0_i32 = arith.constant 0 : i32
    %c0_i32_0 = arith.constant 0 : i32
    return %arg0, %c0_i32 : i32, i32
  }
  func.func @transform_1(%arg0: i32) -> (i32, i32) {
    %c0_i32 = arith.constant 0 : i32
    %c0_i32_0 = arith.constant 0 : i32
    return %arg0, %c0_i32 : i32, i32
  }
  func.func @transform_2(%arg0: i32) -> (i32, i32) {
    %c0_i32 = arith.constant 0 : i32
    %c0_i32_0 = arith.constant 0 : i32
    return %arg0, %c0_i32 : i32, i32
  }
}

</mosaic_0001>

<bundles_post_ra>
// kernel: tpu_custom_call.1
= control target key start
LH: loop header
LB: loop body
LE: loop exit
PB: predicated region body
PF: predicated region fallthrough
CT: control target
= control target key end

     0   :  { %s553_s9 = smov 0   ;;  %s700_s0 = inlined_call_operand.vmem [shape: f32[256,128], index: 0, kind: input, shape index: {}]   ;;  %s701_s1 = inlined_call_operand.vmem [shape: s32[256,1], index: 1, kind: input, shape index: {}]   ;;  %s702_s2 = inlined_call_operand.vmem [shape: f32[256,1], index: 2, kind: output, shape index: {}]  }
   0x1 LB: > { %s472_s10 = sadd.s32 4294967295, %s535_s9   ;;  %p476_p0 = scmp.ge.s32.totalorder %s535_s9, 1  ;;  %s535_s9 = sphi %s553_s9, %s12_s9  }
   0x2   : > { %p124_p1 = scmp.lt.s32.totalorder %s535_s9, 5 }
   0x4   : > { %p125_p2 = pnand %p476_p0, %p124_p1 }
   0x5   : > { %s477_s11 = sshll.u32 (!%p125_p2), %s472_s10, 3 }
   0x6   : > { %128 = sbr.rel (%p125_p2) target bundleno = 339 (0x153), region = 28  ;;  %p152_p3 = scmp.lt.s32.totalorder (!%p125_p2), %s477_s11, 31 }
   0xb   : > { %s704_s11 = smov (!%p152_p3, %s477_s11), 31  ;;  %v537_v6 = vmov 0   ;;  %v281_v52 = vlaneseq  ;;  %vm395_vm8 = vcmask 7168  }
   0xc   : > { %s561_s12 = sshll.u32 %s704_s11, 3  ;;  %495 = vset.pattern.permute.xlu1 %v537_v6  ;;  %494 = vset.pattern.permute.xlu0 %v537_v6 }
   0xd   : > { %s155_s15 = scalar_lea.vmem %s700_s0, %s561_s12  ;;  %496 = vset.pattern.permute.xlu2 %v537_v6  ;;  %s161_s18 = scalar_lea.vmem %s701_s1, %s561_s12  ;;  %v282_v55 = vand.u32 127, %v281_v52 }
   0xe   : > { %v567_v0 = vld [vmem:[%s155_s15 + $0x20] sm:$0xff]  ;;  %v569_v1 = vld [vmem:[%s155_s15 + $0x10] sm:$0xff]  ;;  %v576_v3 = vld [vmem:[%s155_s15 + $0x28] sm:$0xff]  ;;  %s666_s21 = scalar_lea.vmem %s702_s2, %s561_s12 }
   0xf   : > { %v571_v2 = vld [vmem:[%s155_s15] sm:$0xff]  ;;  %193 = vmax.xlane.f32.xlu2 %v567_v0  ;;  %189 = vmax.xlane.f32.xlu1 %v569_v1  ;;  %v578_v4 = vld [vmem:[%s155_s15 + $0x18] sm:$0xff]  ;;  %v580_v5 = vld [vmem:[%s155_s15 + $0x8] sm:$0xff] }
  0x10   : > { %185 = vmax.xlane.f32.xlu0 %v571_v2  ;;  %v585_v7 = vld [vmem:[%s155_s15 + $0x38] sm:$0xff]  ;;  %v587_v8 = vld [vmem:[%s155_s15 + $0x30] sm:$0xff]  ;;  %v177_v9 = vld [vmem:[%s161_s18] sm:$0xff] }
  0x11   : > { %v179_v10 = vld [vmem:[%s161_s18 + $0x10] sm:$0xff]  ;;  %v184_v11 = vld [vmem:[%s161_s18 + $0x38] sm:$0xff]  ;;  %v178_v13 = vld [vmem:[%s161_s18 + $0x8] sm:$0xff] }
  0x12   : > { %v180_v12 = vld [vmem:[%s161_s18 + $0x18] sm:$0xff]  ;;  %v182_v14 = vld [vmem:[%s161_s18 + $0x28] sm:$0xff]  ;;  %v181_v15 = vld [vmem:[%s161_s18 + $0x20] sm:$0xff] }
  0x13   : > { %v183_v16 = vld [vmem:[%s161_s18 + $0x30] sm:$0xff] }
  0x17   : > { %195 = vmax.xlane.f32.xlu2 %v576_v3  ;;  %191 = vmax.xlane.f32.xlu1 %v578_v4 }
  0x18   : > { %187 = vmax.xlane.f32.xlu0 %v580_v5 }
  0x1f   : > { %199 = vmax.xlane.f32.xlu1 %v585_v7  ;;  %267 = vadd.xlane.f32.xlu2 %v580_v5 }
  0x20   : > { %197 = vmax.xlane.f32.xlu0 %v587_v8 }
  0x27   : > { %265 = vadd.xlane.f32.xlu1 %v571_v2  ;;  %273 = vadd.xlane.f32.xlu2 %v567_v0 }
  0x28   : > { %269 = vadd.xlane.f32.xlu0 %v569_v1 }
  0x2f   : > { %271 = vadd.xlane.f32.xlu1 %v578_v4  ;;  %279 = vadd.xlane.f32.xlu2 %v585_v7 }
  0x30   : > { %275 = vadd.xlane.f32.xlu0 %v576_v3 }
  0x37   : > { %277 = vadd.xlane.f32.xlu1 %v587_v8 }
  0x44   : > { %284 = vperm.xlu0 %494, %v177_v9  }
  0x47   : > { %290 = vperm.xlu2 %496, %v179_v10  }
  0x4c   : > { %305 = vperm.xlu0 %494, %v184_v11  }
  0x4f   : > { %293 = vperm.xlu2 %496, %v180_v12  }
  0x50   : > { %287 = vperm.xlu1 %495, %v178_v13  }
  0x57   : > { %299 = vperm.xlu2 %496, %v182_v14  }
  0x58   : > { %296 = vperm.xlu1 %495, %v181_v15  }
  0x60   : > { %302 = vperm.xlu1 %495, %v183_v16  }
  0x82   : > { %v603_v17 = vpop.xlane.xlu2 %193  ;;  %v605_v18 = vpop.xlane.xlu1 %189 }
  0x83   : > { %v203_v19 = vsub.f32 %v569_v1, %v605_v18  ;;  %v609_v20 = vpop.xlane.xlu0 %185  ;;  %v205_v35 = vsub.f32 %v567_v0, %v603_v17 }
  0x84   : > { %v201_v21 = vsub.f32 %v571_v2, %v609_v20 }
  0x85   : > { %v213_v22 = vmul.f32 1.442695, %v203_v19  ;;  %v217_v37 = vmul.f32 1.442695, %v205_v35 }
  0x86   : > { %v209_v23 = vmul.f32 1.442695, %v201_v21 }
  0x87   : > { %497 = vpow2.f32 %v213_v22 }
  0x88   : > { %499 = vpow2.f32 %v209_v23 }
  0x8a   : > { %v613_v24 = vpop.xlane.xlu2 %195  ;;  %v615_v25 = vpop.xlane.xlu1 %191 }
  0x8b   : > { %v206_v26 = vsub.f32 %v576_v3, %v613_v24  ;;  %v204_v27 = vsub.f32 %v578_v4, %v615_v25  ;;  %v621_v28 = vpop.xlane.xlu0 %187 }
  0x8c   : > { %v202_v29 = vsub.f32 %v580_v5, %v621_v28 }
  0x8d   : > { %v219_v30 = vmul.f32 1.442695, %v206_v26  ;;  %v215_v31 = vmul.f32 1.442695, %v204_v27  ;;  %v498_v32 = vpop.eup %497 }
  0x8e   : > { %v211_v33 = vmul.f32 1.442695, %v202_v29  ;;  %v500_v34 = vpop.eup %499  ;;  %229 = vadd.xlane.f32.xlu1 %v498_v32 }
  0x8f   : > { %501 = vpow2.f32 %v219_v30  ;;  %225 = vadd.xlane.f32.xlu2 %v500_v34 }
  0x90   : > { %503 = vpow2.f32 %v215_v31 }
  0x91   : > { %505 = vpow2.f32 %v211_v33 }
  0x92   : > { %v627_v36 = vpop.xlane.xlu2 %267  ;;  %v633_v42 = vpop.xlane.xlu1 %199  ;;  %507 = vpow2.f32 %v217_v37 }
  0x93   : > { %v629_v38 = vpop.xlane.xlu0 %197  ;;  %v208_v45 = vsub.f32 %v585_v7, %v633_v42 }
  0x94   : > { %v207_v39 = vsub.f32 %v587_v8, %v629_v38 }
  0x95   : > { %v502_v40 = vpop.eup %501  ;;  %v223_v48 = vmul.f32 1.442695, %v208_v45 }
  0x96   : > { %v504_v41 = vpop.eup %503  ;;  %v221_v43 = vmul.f32 1.442695, %v207_v39  ;;  %235 = vadd.xlane.f32.xlu1 %v502_v40 }
  0x97   : > { %v506_v44 = vpop.eup %505  ;;  %231 = vadd.xlane.f32.xlu2 %v504_v41 }
  0x98   : > { %509 = vpow2.f32 %v221_v43  ;;  %227 = vadd.xlane.f32.xlu0 %v506_v44  ;;  %v508_v47 = vpop.eup %507 }
  0x99   : > { %511 = vpow2.f32 %v223_v48 }
  0x9a   : > { %v637_v46 = vpop.xlane.xlu2 %273  ;;  %v643_v53 = vpop.xlane.xlu1 %265 }
  0x9b   : > { %v641_v51 = vpop.xlane.xlu0 %269 }
  0x9e   : > { %v510_v49 = vpop.eup %509 }
  0x9f   : > { %237 = vadd.xlane.f32.xlu2 %v510_v49  ;;  %v512_v54 = vpop.eup %511 }
  0xa0   : > { %233 = vadd.xlane.f32.xlu0 %v508_v47 }
  0xa2   : > { %v639_v50 = vpop.xlane.xlu2 %279  ;;  %v648_v59 = vpop.xlane.xlu1 %271 }
  0xa3   : > { %v645_v57 = vpop.xlane.xlu0 %275 }
  0xa8   : > { %239 = vadd.xlane.f32.xlu0 %v512_v54 }
  0xaa   : > { %v291_v56 = vpop.permute.xlu2 %290  ;;  %v651_v63 = vpop.xlane.xlu1 %277 }
  0xab   : > { %vm309_vm0 = vcmp.eq.s32.totalorder %v282_v55, %v291_v56 }
  0xac   : > { %v317_v58 = vsel %vm309_vm0, %v569_v1, 0.0 }
  0xb0   : > { %327 = vadd.xlane.f32.xlu0 %v317_v58 }
  0xb2   : > { %v294_v62 = vpop.permute.xlu2 %293 }
  0xb3   : > { %vm310_vm2 = vcmp.eq.s32.totalorder %v282_v55, %v294_v62 }
  0xb4   : > { %v318_v6 = vsel %vm310_vm2, %v578_v4, 0.0 }
  0xb6   : > { %v285_v60 = vpop.permute.xlu0 %284 }
  0xb7   : > { %vm307_vm1 = vcmp.eq.s32.totalorder %v282_v55, %v285_v60 }
  0xb8   : > { %v315_v61 = vsel %vm307_vm1, %v571_v2, 0.0 }
  0xb9   : > { %323 = vadd.xlane.f32.xlu2 %v315_v61 }
  0xba   : > { %v300_v9 = vpop.permute.xlu2 %299 }
  0xbb   : > { %vm312_vm4 = vcmp.eq.s32.totalorder %v282_v55, %v300_v9 }
  0xbc   : > { %v320_v11 = vsel %vm312_vm4, %v576_v3, 0.0 }
  0xbe   : > { %v306_v13 = vpop.permute.xlu0 %305 }
  0xbf   : > { %vm314_vm6 = vcmp.eq.s32.totalorder %v282_v55, %v306_v13 }
  0xc0   : > { %v322_v15 = vsel %vm314_vm6, %v585_v7, 0.0 }
  0xc1   : > { %329 = vadd.xlane.f32.xlu2 %v318_v6 }
  0xc2   : > { %v288_v10 = vpop.permute.xlu1 %287 }
  0xc3   : > { %vm308_vm3 = vcmp.eq.s32.totalorder %v282_v55, %v288_v10 }
  0xc4   : > { %v316_v1 = vsel %vm308_vm3, %v580_v5, 0.0 }
  0xc5   : > { %325 = vadd.xlane.f32.xlu1 %v316_v1 }
  0xc9   : > { %333 = vadd.xlane.f32.xlu2 %v320_v11 }
  0xca   : > { %v297_v12 = vpop.permute.xlu1 %296 }
  0xcb   : > { %vm311_vm5 = vcmp.eq.s32.totalorder %v282_v55, %v297_v12 }
  0xcc   : > { %v319_v2 = vsel %vm311_vm5, %v567_v0, 0.0 }
  0xcd   : > { %331 = vadd.xlane.f32.xlu1 %v319_v2 }
  0xd2   : > { %v303_v14 = vpop.permute.xlu1 %302 }
  0xd3   : > { %vm313_vm7 = vcmp.eq.s32.totalorder %v282_v55, %v303_v14 }
  0xd4   : > { %v321_v4 = vsel %vm313_vm7, %v587_v8, 0.0 }
  0xd5   : > { %335 = vadd.xlane.f32.xlu0 %v321_v4  ;;  %337 = vadd.xlane.f32.xlu1 %v322_v15 }
 0x101   : > { %v230_v5 = vpop.xlane.xlu1 %229 }
 0x102   : > { %513 = vlog2.f32 %v230_v5  ;;  %v226_v3 = vpop.xlane.xlu2 %225 }
 0x103   : > { %515 = vlog2.f32 %v226_v3 }
 0x108   : > { %v514_v19 = vpop.eup %513 }
 0x109   : > { %v246_v22 = vmul.f32 0.6931472, %v514_v19  ;;  %v516_v27 = vpop.eup %515  ;;  %v236_v7 = vpop.xlane.xlu1 %235 }
 0x10a   : > { %v232_v0 = vpop.xlane.xlu2 %231  ;;  %v242_v8 = vmul.f32 0.6931472, %v516_v27 }
 0x10b   : > { %v228_v16 = vpop.xlane.xlu0 %227  ;;  %v259_v23 = vadd.f32 %v246_v22, %v605_v18  ;;  %517 = vlog2.f32 %v232_v0 }
 0x10c   : > { %519 = vlog2.f32 %v228_v16  ;;  %v257_v32 = vadd.f32 %v242_v8, %v609_v20 }
 0x10d   : > { %v341_v29 = vmul.f32 128.0, %v259_v23  ;;  %521 = vlog2.f32 %v236_v7 }
 0x10e   : > { %v339_v41 = vmul.f32 128.0, %v257_v32 }
 0x10f   : > { %v349_v30 = vsub.f32 %v641_v51, %v341_v29 }
 0x110   : > { %v347_v47 = vsub.f32 %v643_v53, %v339_v41 }
 0x111   : > { %v518_v33 = vpop.eup %517  ;;  %v365_v37 = vmul.f32 0.0007874016, %v349_v30 }
 0x112   : > { %v238_v34 = vpop.xlane.xlu2 %237  ;;  %v520_v18 = vpop.eup %519  ;;  %v248_v40 = vmul.f32 0.6931472, %v518_v33  ;;  %v363_v55 = vmul.f32 0.0007874016, %v347_v47 }
 0x113   : > { %v234_v21 = vpop.xlane.xlu0 %233  ;;  %v244_v44 = vmul.f32 0.6931472, %v520_v18  ;;  %v522_v45 = vpop.eup %521 }
 0x114   : > { %523 = vlog2.f32 %v234_v21  ;;  %v260_v48 = vadd.f32 %v248_v40, %v615_v25  ;;  %v252_v52 = vmul.f32 0.6931472, %v522_v45 }
 0x115   : > { %v258_v54 = vadd.f32 %v244_v44, %v621_v28  ;;  %525 = vlog2.f32 %v238_v34 }
 0x116   : > { %v342_v58 = vmul.f32 128.0, %v260_v48  ;;  %v262_v53 = vadd.f32 %v252_v52, %v613_v24 }
 0x117   : > { %v340_v62 = vmul.f32 128.0, %v258_v54 }
 0x118   : > { %v350_v9 = vsub.f32 %v648_v59, %v342_v58  ;;  %v344_v11 = vmul.f32 128.0, %v262_v53 }
 0x119   : > { %v348_v28 = vsub.f32 %v627_v36, %v340_v62 }
 0x11a   : > { %v524_v60 = vpop.eup %523  ;;  %v366_v2 = vmul.f32 0.0007874016, %v350_v9  ;;  %v352_v59 = vsub.f32 %v645_v57, %v344_v11 }
 0x11b   : > { %v240_v26 = vpop.xlane.xlu0 %239  ;;  %v250_v6 = vmul.f32 0.6931472, %v524_v60  ;;  %v526_v12 = vpop.eup %525  ;;  %v364_v3 = vmul.f32 0.0007874016, %v348_v28 }
 0x11c   : > { %527 = vlog2.f32 %v240_v26  ;;  %v254_v16 = vmul.f32 0.6931472, %v526_v12 }
 0x11d   : > { %v261_v14 = vadd.f32 %v250_v6, %v603_v17  ;;  %v368_v17 = vmul.f32 0.0007874016, %v352_v59 }
 0x11e   : > { %v263_v27 = vadd.f32 %v254_v16, %v629_v38 }
 0x11f   : > { %v343_v36 = vmul.f32 128.0, %v261_v14 }
 0x120   : > { %v345_v33 = vmul.f32 128.0, %v263_v27 }
 0x121   : > { %v351_v7 = vsub.f32 %v637_v46, %v343_v36 }
 0x122   : > { %v528_v4 = vpop.eup %527  ;;  %v353_v18 = vsub.f32 %v651_v63, %v345_v33 }
 0x123   : > { %v328_v31 = vpop.xlane.xlu0 %327  ;;  %v256_v19 = vmul.f32 0.6931472, %v528_v4 }
 0x124   : > { %v357_v35 = vsub.f32 %v328_v31, %v259_v23 }
 0x125   : > { %v264_v57 = vadd.f32 %v256_v19, %v633_v42 }
 0x126   : > { %v373_v39 = vmul.f32 0.8992126, %v357_v35  ;;  %v367_v35 = vmul.f32 0.0007874016, %v351_v7 }
 0x128   : > { %v381_v43 = vadd.f32 %v373_v39, %v365_v37  ;;  %v346_v39 = vmul.f32 128.0, %v264_v57 }
 0x12a   : > { %v389_v20 = vsub.f32 0.0, %v381_v43  ;;  %v354_v42 = vsub.f32 %v639_v50, %v346_v39 }
 0x12c   : > { %398 = vst.msk [vmem:[%s666_s21 + $0x10] sm:$0xff] %vm395_vm8, %v389_v20  ;;  %v324_v49 = vpop.xlane.xlu2 %323  ;;  %v369_v20 = vmul.f32 0.0007874016, %v353_v18  ;;  %v370_v45 = vmul.f32 0.0007874016, %v354_v42 }
 0x12d   : > { %v355_v51 = vsub.f32 %v324_v49, %v257_v32 }
 0x12f   : > { %v371_v56 = vmul.f32 0.8992126, %v355_v51 }
 0x131   : > { %v379_v61 = vadd.f32 %v371_v56, %v363_v55 }
 0x133   : > { %v387_v25 = vsub.f32 0.0, %v379_v61 }
 0x134   : > { %v330_v10 = vpop.xlane.xlu2 %329 }
 0x135   : > { %396 = vst.msk [vmem:[%s666_s21] sm:$0xff] %vm395_vm8, %v387_v25  ;;  %v358_v1 = vsub.f32 %v330_v10, %v260_v48 }
 0x137   : > { %v374_v13 = vmul.f32 0.8992126, %v358_v1 }
 0x138   : > { %v326_v15 = vpop.xlane.xlu1 %325 }
 0x139   : > { %v382_v24 = vadd.f32 %v374_v13, %v366_v2  ;;  %v356_v5 = vsub.f32 %v326_v15, %v258_v54 }
 0x13b   : > { %v390_v21 = vsub.f32 0.0, %v382_v24  ;;  %v372_v22 = vmul.f32 0.8992126, %v356_v5 }
 0x13c   : > { %v334_v0 = vpop.xlane.xlu2 %333 }
 0x13d   : > { %399 = vst.msk [vmem:[%s666_s21 + $0x18] sm:$0xff] %vm395_vm8, %v390_v21  ;;  %v380_v23 = vadd.f32 %v372_v22, %v364_v3  ;;  %v360_v26 = vsub.f32 %v334_v0, %v262_v53 }
 0x13f   : > { %v388_v29 = vsub.f32 0.0, %v380_v23  ;;  %v376_v8 = vmul.f32 0.8992126, %v360_v26 }
 0x140   : > { %v332_v30 = vpop.xlane.xlu1 %331 }
 0x141   : > { %397 = vst.msk [vmem:[%s666_s21 + $0x8] sm:$0xff] %vm395_vm8, %v388_v29  ;;  %v384_v31 = vadd.f32 %v376_v8, %v368_v17  ;;  %v359_v32 = vsub.f32 %v332_v30, %v261_v14 }
 0x143   : > { %v392_v34 = vsub.f32 0.0, %v384_v31  ;;  %v375_v37 = vmul.f32 0.8992126, %v359_v32 }
 0x145   : > { %401 = vst.msk [vmem:[%s666_s21 + $0x28] sm:$0xff] %vm395_vm8, %v392_v34  ;;  %v383_v38 = vadd.f32 %v375_v37, %v367_v35 }
 0x147   : > { %v391_v46 = vsub.f32 0.0, %v383_v38 }
 0x148   : > { %v338_v40 = vpop.xlane.xlu1 %337  ;;  %v336_v41 = vpop.xlane.xlu0 %335 }
 0x149   : > { %400 = vst.msk [vmem:[%s666_s21 + $0x20] sm:$0xff] %vm395_vm8, %v391_v46  ;;  %v362_v43 = vsub.f32 %v338_v40, %v264_v57  ;;  %v361_v44 = vsub.f32 %v336_v41, %v263_v27 }
 0x14b   : > { %v378_v47 = vmul.f32 0.8992126, %v362_v43  ;;  %v377_v48 = vmul.f32 0.8992126, %v361_v44 }
 0x14d   : > { %v386_v49 = vadd.f32 %v378_v47, %v370_v45  ;;  %v385_v51 = vadd.f32 %v377_v48, %v369_v20 }
 0x14f   : > { %v394_v52 = vsub.f32 0.0, %v386_v49  ;;  %v393_v54 = vsub.f32 0.0, %v385_v51 }
 0x151   : > { %403 = vst.msk [vmem:[%s666_s21 + $0x38] sm:$0xff] %vm395_vm8, %v394_v52 }
 0x152   : > { %402 = vst.msk [vmem:[%s666_s21 + $0x30] sm:$0xff] %vm395_vm8, %v393_v54 }
 0x153 PF: > { %s12_s9 = sadd.s32 1, %s535_s9  }
 0x154   : > { %p9_p4 = scmp.ge.s32.totalorder %s12_s9, 6  }
 0x156   :  { %11 = sbr.rel (!%p9_p4) target bundleno = 1 (0x1), region = 61 }

</bundles_post_ra>
